<compile_context>
chip_gen: v7x
topology: tpu7x:2x2x1
jax: 0.10.0
libtpu: 0.0.40
codegen_flags: <defaults>
</compile_context>

<pallas_src>
import functools

import jax
import jax.numpy as jnp
from jax.experimental import pallas as pl
from jax.experimental.pallas import tpu as pltpu


def _tv_kernel(wm_ref, hm_ref, x_ref, out_ref, acc_ref, *, w: int, l: int):
    """wm_ref/hm_ref: (1, L) f32 multiplicative lane masks (constant index_map,
    DMA'd once); x_ref: (T, L) tile, L = H*W (lane-dense); out_ref: (1, 1) SMEM
    partial sum for this chunk; acc_ref: (T, 1) f32 per-row accumulator."""
    step = pl.program_id(1)

    @pl.when(step == 0)
    def _():
        acc_ref[...] = jnp.zeros_like(acc_ref)

    # Cast once after load: bf16 stays bf16 in HBM (half the DMA bytes) but all
    # arithmetic runs in f32 (no bf16 VALU emulation on v5e, better accuracy).
    x = x_ref[...].astype(jnp.float32)

    # roll(x, l-1)[k] == x[(k+1) % l]  -> W-direction neighbor   (XLU, off VALU)
    # roll(x, l-w)[k] == x[(k+w) % l]  -> H-direction neighbor
    dw = pltpu.roll(x, l - 1, axis=1) - x
    dh = pltpu.roll(x, l - w, axis=1) - x

    # Precomputed {0,1} masks drop the pairs straddling a row end / wrapping
    # past the last image row.  (1, L) operands sublane-broadcast cheaply.
    d = jnp.abs(dw) * wm_ref[...] + jnp.abs(dh) * hm_ref[...]

    # Per-step lane reduction into a tiny (T, 1) accumulator: no full-tile f32
    # read-modify-write and no block-sized accumulator eating VMEM.
    acc_ref[...] += jnp.sum(d, axis=1, keepdims=True)

    @pl.when(step == pl.num_programs(1) - 1)
    def _():
        out_ref[0, 0] = jnp.sum(acc_ref[...])


def _round_up(a, b):
    return -(-a // b) * b


def tv_loss_forward(x, strength, *, block_bytes=8 * 1024 * 1024, num_cores=None):
    """Mirrors TVLoss.forward: returns (input, loss)."""
    n, c, h, w = x.shape
    rows = n * c
    l = h * w
    x_flat = x.reshape(rows, l)
    itemsize = x_flat.dtype.itemsize

    # Rows per block: multiple of 8 (sublane), sized against block_bytes.  With
    # the full-tile accumulator gone, blocks can be larger, amortizing the
    # ~0.35 us per-step pipeline overhead (matters most vs v7x's 3.2 TB/s HBM).
    budget_rows = max(8, (block_bytes // (l * itemsize)) // 8 * 8)
    t = min(_round_up(rows, 8), budget_rows)

    total_blocks = -(-rows // t)
    if num_cores is None:
        try:
            num_cores = int(getattr(jax.devices()[0], "num_cores", 0)) or 2
        except Exception:  # defensive: fall back to the previously-valid default
            num_cores = 2
    num_chunks = num_cores if total_blocks >= num_cores else 1
    steps = -(-total_blocks // num_chunks)
    padded_rows = num_chunks * steps * t
    if padded_rows != rows:
        # Zero rows contribute exactly 0 to the loss (rolls never mix rows).
        x_flat = jnp.pad(x_flat, ((0, padded_rows - rows), (0, 0)))

    # Lane masks hoisted out of the kernel hot loop: built once here, DMA'd
    # once (constant index_map below), applied as multiplicative {0,1} masks.
    k = jnp.arange(l, dtype=jnp.int32)
    wmask = ((k % w) != (w - 1)).astype(jnp.float32).reshape(1, l)
    hmask = (k < (l - w)).astype(jnp.float32).reshape(1, l)

    # Double-buffered input + two tiny masks + (t, 1) accumulator + margin.
    # Raising above the scoped default lifts v5e's 16 MiB ceiling; capped well
    # under v7x's 64 MiB/TC physical VMEM.
    vmem_limit = 2 * t * l * itemsize + 4 * l * 4 + t * 4 + (8 << 20)
    vmem_limit = int(min(100 * 1024 * 1024, max(32 * 1024 * 1024, vmem_limit)))

    kernel = functools.partial(_tv_kernel, w=w, l=l)
    partials = pl.pallas_call(
        kernel,
        out_shape=jax.ShapeDtypeStruct((num_chunks, 1), jnp.float32),
        grid_spec=pltpu.PrefetchScalarGridSpec(
            num_scalar_prefetch=0,
            grid=(num_chunks, steps),
            in_specs=[
                pl.BlockSpec((1, l), lambda ci, si: (0, 0)),   # w-mask (loaded once)
                pl.BlockSpec((1, l), lambda ci, si: (0, 0)),   # h-mask (loaded once)
                pl.BlockSpec((t, l), lambda ci, si: (ci * steps + si, 0)),
            ],
            out_specs=pl.BlockSpec(
                (1, 1), lambda ci, si: (ci, 0), memory_space=pltpu.SMEM
            ),
            scratch_shapes=[pltpu.VMEM((t, 1), jnp.float32)],
        ),
        compiler_params=pltpu.CompilerParams(
            dimension_semantics=("parallel", "arbitrary"),
            vmem_limit_bytes=vmem_limit,
        ),
    )(wmask, hmask, x_flat)

    loss = jnp.asarray(strength, jnp.float32) * jnp.sum(partials)
    return x, loss


def tv_loss_ref(x, strength):
    x_diff = x[:, :, 1:, :] - x[:, :, :-1, :]
    y_diff = x[:, :, :, 1:] - x[:, :, :, :-1]
    return strength * (jnp.sum(jnp.abs(x_diff)) + jnp.sum(jnp.abs(y_diff)))


if __name__ == "__main__":
    key = jax.random.PRNGKey(0)

    # Test 1: shape implied by the module (NCHW), single block / single chunk.
    x = jax.random.normal(key, (2, 4, 16, 16), dtype=jnp.float32)
    strength = 0.5
    out, loss = tv_loss_forward(x, strength)
    out = jax.block_until_ready(out)
    loss = jax.block_until_ready(loss)
    ref = tv_loss_ref(x, strength)
    assert jnp.allclose(out, x), "forward must return input unchanged"
    assert jnp.allclose(loss, ref, rtol=1e-5, atol=1e-5), (loss, ref)

    # Test 2: non-multiple-of-8 N*C + tiny block budget -> exercises the
    # zero-padding, multi-block and multi-chunk partial-sum paths.
    key2 = jax.random.PRNGKey(1)
    x2 = jax.random.normal(key2, (3, 5, 8, 16), dtype=jnp.float32)
    out2, loss2 = tv_loss_forward(x2, 2.0, block_bytes=4096)
    loss2 = jax.block_until_ready(loss2)
    ref2 = tv_loss_ref(x2, 2.0)
    assert jnp.allclose(loss2, ref2, rtol=1e-5, atol=1e-5), (loss2, ref2)

    # Test 3: bf16 input -> bf16 in HBM, f32 arithmetic in-kernel.
    key3 = jax.random.PRNGKey(2)
    x3 = jax.random.normal(key3, (2, 4, 16, 16), dtype=jnp.float32).astype(jnp.bfloat16)
    out3, loss3 = tv_loss_forward(x3, 1.5)
    loss3 = jax.block_until_ready(loss3)
    ref3 = tv_loss_ref(x3.astype(jnp.float32), 1.5)
    assert jnp.allclose(out3, x3), "forward must return input unchanged"
    assert jnp.allclose(loss3, ref3, rtol=1e-4, atol=1e-4), (loss3, ref3)

    print("KERNEL_OK")
</pallas_src>

<mosaic_0001>
module attributes {stable_mosaic.version = 11 : i64} {
  func.func @_tv_kernel(%arg0: i32, %arg1: i32, %arg2: memref<1x256xf32, #tpu.memory_space<vmem>>, %arg3: memref<1x256xf32, #tpu.memory_space<vmem>>, %arg4: memref<8x256xf32, #tpu.memory_space<vmem>>, %arg5: memref<1x1xf32, #tpu.memory_space<smem>>, %arg6: memref<8x1xf32, #tpu.memory_space<vmem>>) attributes {dimension_semantics = [#tpu.dimension_semantics<parallel>, #tpu.dimension_semantics<arbitrary>], iteration_bounds = array<i64: 1, 1>, scalar_prefetch = 0 : i64, scratch_operands = 1 : i64, tpu.core_type = #tpu.core_type<tc>, window_params = [{pipeline_mode = #tpu.pipeline_mode<synchronous>, transform_indices = @transform_0, window_bounds = array<i64: 1, 256>}, {pipeline_mode = #tpu.pipeline_mode<synchronous>, transform_indices = @transform_1, window_bounds = array<i64: 1, 256>}, {transform_indices = @transform_2, window_bounds = array<i64: 8, 256>}, {transform_indices = @transform_3, window_bounds = array<i64: 1, 1>}]} {
    %c0_i32 = arith.constant 0 : i32
    %0 = arith.cmpi eq, %arg1, %c0_i32 : i32
    %1 = arith.extui %0 : i1 to i32
    %c0_i32_0 = arith.constant 0 : i32
    %2 = arith.cmpi ne, %1, %c0_i32_0 : i32
    scf.if %2 {
      %cst_12 = arith.constant 0.000000e+00 : f32
      %25 = vector.broadcast %cst_12 : f32 to vector<8x1xf32>
      %c0_13 = arith.constant 0 : index
      %c0_14 = arith.constant 0 : index
      %26 = vector.load %arg6[%c0_13, %c0_14] : memref<8x1xf32, #tpu.memory_space<vmem>>, vector<8x1xf32>
      tpu.vector_store %arg6[%c0_13, %c0_14], %25 {strides = array<i32>} : memref<8x1xf32, #tpu.memory_space<vmem>>, vector<8x1xf32>,
    } else {
    }
    %c0 = arith.constant 0 : index
    %c0_1 = arith.constant 0 : index
    %3 = vector.load %arg4[%c0, %c0_1] : memref<8x256xf32, #tpu.memory_space<vmem>>, vector<8x256xf32>
    %c255_i32 = arith.constant 255 : i32
    %4 = tpu.dynamic_rotate %3 by %c255_i32 dim 1 : vector<8x256xf32>, i32 -> vector<8x256xf32>
    %5 = arith.subf %4, %3 : vector<8x256xf32>
    %c240_i32 = arith.constant 240 : i32
    %6 = tpu.dynamic_rotate %3 by %c240_i32 dim 1 : vector<8x256xf32>, i32 -> vector<8x256xf32>
    %7 = arith.subf %6, %3 : vector<8x256xf32>
    %8 = math.absf %5 : vector<8x256xf32>
    %c0_2 = arith.constant 0 : index
    %c0_3 = arith.constant 0 : index
    %9 = vector.load %arg2[%c0_2, %c0_3] : memref<1x256xf32, #tpu.memory_space<vmem>>, vector<1x256xf32>
    %10 = vector.broadcast %9 : vector<1x256xf32> to vector<8x256xf32>
    %11 = arith.mulf %8, %10 : vector<8x256xf32>
    %12 = math.absf %7 : vector<8x256xf32>
    %c0_4 = arith.constant 0 : index
    %c0_5 = arith.constant 0 : index
    %13 = vector.load %arg3[%c0_4, %c0_5] : memref<1x256xf32, #tpu.memory_space<vmem>>, vector<1x256xf32>
    %14 = vector.broadcast %13 : vector<1x256xf32> to vector<8x256xf32>
    %15 = arith.mulf %12, %14 : vector<8x256xf32>
    %16 = arith.addf %11, %15 : vector<8x256xf32>
    %c0_6 = arith.constant 0 : index
    %c0_7 = arith.constant 0 : index
    %17 = vector.load %arg6[%c0_6, %c0_7] : memref<8x1xf32, #tpu.memory_space<vmem>>, vector<8x1xf32>
    %cst = arith.constant dense<0.000000e+00> : vector<8xf32>
    %18 = vector.multi_reduction <add>, %16, %cst [1] : vector<8x256xf32> to vector<8xf32>
    %19 = vector.shape_cast %18 : vector<8xf32> to vector<8x1xf32>
    %20 = arith.addf %17, %19 : vector<8x1xf32>
    %c0_8 = arith.constant 0 : index
    %c0_9 = arith.constant 0 : index
    %21 = vector.load %arg6[%c0_8, %c0_9] : memref<8x1xf32, #tpu.memory_space<vmem>>, vector<8x1xf32>
    tpu.vector_store %arg6[%c0_8, %c0_9], %20 {strides = array<i32>} : memref<8x1xf32, #tpu.memory_space<vmem>>, vector<8x1xf32>,
    %c0_i32_10 = arith.constant 0 : i32
    %22 = arith.cmpi eq, %arg1, %c0_i32_10 : i32
    %23 = arith.extui %22 : i1 to i32
    %c0_i32_11 = arith.constant 0 : i32
    %24 = arith.cmpi ne, %23, %c0_i32_11 : i32
    scf.if %24 {
      %c0_12 = arith.constant 0 : index
      %c0_13 = arith.constant 0 : index
      %25 = vector.load %arg6[%c0_12, %c0_13] : memref<8x1xf32, #tpu.memory_space<vmem>>, vector<8x1xf32>
      %26 = vector.shape_cast %25 : vector<8x1xf32> to vector<1x8x1xf32>
      %cst_14 = arith.constant dense<0.000000e+00> : vector<1xf32>
      %27 = vector.multi_reduction <add>, %26, %cst_14 [1, 2] : vector<1x8x1xf32> to vector<1xf32>
      %28 = vector.shape_cast %27 : vector<1xf32> to vector<1x1x1xf32>
      %29 = vector.extract %28[0, 0, 0] : f32 from vector<1x1x1xf32>
      %c0_15 = arith.constant 0 : index
      %c0_16 = arith.constant 0 : index
      %30 = memref.load %arg5[%c0_15, %c0_16] : memref<1x1xf32, #tpu.memory_space<smem>>
      memref.store %29, %arg5[%c0_15, %c0_16] : memref<1x1xf32, #tpu.memory_space<smem>>
    } else {
    }
    return
  }
  func.func @transform_0(%arg0: i32, %arg1: i32) -> (i32, i32) {
    %c0_i32 = arith.constant 0 : i32
    %c0_i32_0 = arith.constant 0 : i32
    %c0_i32_1 = arith.constant 0 : i32
    return %c0_i32, %c0_i32_0 : i32, i32
  }
  func.func @transform_1(%arg0: i32, %arg1: i32) -> (i32, i32) {
    %c0_i32 = arith.constant 0 : i32
    %c0_i32_0 = arith.constant 0 : i32
    %c0_i32_1 = arith.constant 0 : i32
    return %c0_i32, %c0_i32_0 : i32, i32
  }
  func.func @transform_2(%arg0: i32, %arg1: i32) -> (i32, i32) {
    %c1_i32 = arith.constant 1 : i32
    %0 = arith.muli %arg0, %c1_i32 : i32
    %1 = arith.addi %0, %arg1 : i32
    %c0_i32 = arith.constant 0 : i32
    %c0_i32_0 = arith.constant 0 : i32
    return %1, %c0_i32 : i32, i32
  }
  func.func @transform_3(%arg0: i32, %arg1: i32) -> (i32, i32) {
    %c0_i32 = arith.constant 0 : i32
    %c0_i32_0 = arith.constant 0 : i32
    return %arg0, %c0_i32 : i32, i32
  }
}

</mosaic_0001>

<bundles_post_ra>
// kernel: tpu_custom_call.1
= control target key start
LH: loop header
LB: loop body
LE: loop exit
PB: predicated region body
PF: predicated region fallthrough
CT: control target
= control target key end

     0   :  { %8 = vsyncpa [#allocation4], 0  ;;  %s280_s0 = inlined_call_operand.hbm [shape: f32[1,256], index: 0, kind: input, shape index: {}]   ;;  %s281_s1 = inlined_call_operand.vmem [shape: f32[1,256], index: 1, kind: input, shape index: {}]   ;;  %s282_s2 = inlined_call_operand.hbm [shape: f32[8,256], index: 2, kind: input, shape index: {}]   ;;  %s283_s3 = inlined_call_operand.hbm [shape: f32[1,1], index: 3, kind: output, shape index: {}]  }
   0x1   :  { %9 = vsyncpa [#allocation7], 0 }
   0x2   :  { %10 = vsyncpa [#allocation5], 0  ;;  %s212_s12 = smov [#allocation3]   ;;  %s213_s14 = smov [#allocation6]  }
   0x3   :  { %s17_s13 = sshll.u32 %s212_s12, 4  ;;  %s33_s15 = sshll.u32 %s213_s14, 4  ;;  %s18_s13 = int_to_ptr.vmem [resolvable:$true] %s17_s13  ;;  %s34_s15 = int_to_ptr.vmem [resolvable:$true] %s33_s15 }
   0x4   :  { %s152_s18 = scalar_lea.hbm %s280_s0, 32 }
   0x5   :  { %p153_p0 = scmp.ne.s32.totalorder %s280_s0, %s152_s18  ;;  %p156_p1 = scmp.lt.u32.totalorder %s152_s18, %s280_s0 }
   0x7   :  { %p158_p2 = pnand %p156_p1, %p153_p0 }
   0x9   :  { %161 = shalt.err (!%p158_p2)
}
   0xa   :  { %s162_s23 = scalar_lea.vmem %s18_s13, 32  ;;  %p167_p4 = scmp.lt.s32.totalorder %s18_s13, %s18_s13 }
   0xb   :  { %p163_p3 = scmp.ne.s32.totalorder %s18_s13, %s162_s23  ;;  %p168_p5 = scmp.lt.s32.totalorder %s162_s23, %s162_s23 }
   0xd   :  { %p169_p6 = por %p168_p5, %p167_p4 }
   0xf   :  { %p170_p7 = pnand %p169_p6, %p163_p3 }
  0x11   :  { %173 = shalt.err (!%p170_p7)
}
  0x12   :  { %20 = dma.hbm_to_vmem [thread:$0]  %s280_s0, 32, %s18_s13, [#allocation4]  }
  0x13   :  { %s174_s28 = scalar_lea.hbm %s282_s2, 256 }
  0x14   :  { %p175_p8 = scmp.ne.s32.totalorder %s282_s2, %s174_s28  ;;  %p178_p9 = scmp.lt.u32.totalorder %s174_s28, %s282_s2 }
  0x16   :  { %p180_p10 = pnand %p178_p9, %p175_p8 }
  0x18   :  { %183 = shalt.err (!%p180_p10)
}
  0x19   :  { %s184_s6 = scalar_lea.vmem %s34_s15, 256  ;;  %p189_p12 = scmp.lt.s32.totalorder %s34_s15, %s34_s15 }
  0x1a   :  { %p185_p11 = scmp.ne.s32.totalorder %s34_s15, %s184_s6  ;;  %p190_p13 = scmp.lt.s32.totalorder %s184_s6, %s184_s6 }
  0x1c   :  { %p191_p0 = por %p190_p13, %p189_p12 }
  0x1e   :  { %p192_p1 = pnand %p191_p0, %p185_p11 }
  0x20   :  { %195 = shalt.err (!%p192_p1)
}
  0x21   :  { %36 = dma.hbm_to_vmem [thread:$0]  %s282_s2, 256, %s34_s15, [#allocation7]  }
  0x22   :  { %206 = dma.done.wait [#allocation4], 32  }
  0x23   :  { %207 = vsyncadd [#allocation4], 4294967264 }
  0x24   :  { %208 = dma.done.wait [#allocation7], 256  }
  0x25   :  { %209 = vsyncadd [#allocation7], 4294967040  ;;  %v50_v0 = vld [vmem:[#allocation6] sm:$0xff]  ;;  %s214_s8 = smov 112   ;;  %s215_s9 = smov 127   ;;  %v51_v1 = vld [vmem:[#allocation6 + $0x8] sm:$0xff]  ;;  %v56_v3 = vlaneseq }
  0x26   :  { %63 = vrot.lane.b32.xlu1 %v50_v0, %s214_s8  ;;  %52 = vrot.lane.b32.xlu0 %v50_v0, %s215_s9  ;;  %vm48_vm0 = vcmask 7168   ;;  %v216_v2 = vmov 0.0   ;;  %v90_v10 = vld [vmem:[%s281_s1] sm:$0x3]  ;;  %v74_v11 = vld [vmem:[#allocation3] sm:$0x3] }
  0x27   :  { %49 = vst.msk [vmem:[#allocation2] sm:$0xff] %vm48_vm0, %v216_v2  ;;  %v77_v4 = vshrl.u32 %v56_v3, 7  ;;  %v57_v5 = vand.u32 127, %v56_v3  ;;  %s196_s13 = scalar_lea.hbm %s283_s3, 16 }
  0x28   :  { %p197_p2 = scmp.ne.s32.totalorder %s283_s3, %s196_s13  ;;  %p200_p3 = scmp.lt.u32.totalorder %s196_s13, %s283_s3 }
  0x29   :  { %v78_v8 = vsub.s32 0, %v77_v4  ;;  %v82_v9 = vsub.s32 1, %v77_v4  ;;  %vm67_vm1 = vcmp.lt.s32.totalorder %v57_v5, 112  ;;  %vm58_vm2 = vcmp.lt.s32.totalorder %v57_v5, 127 }
  0x2a   :  { %65 = vrot.lane.b32.xlu1 %v51_v1, %s214_s8  ;;  %54 = vrot.lane.b32.xlu0 %v51_v1, %s215_s9  ;;  %p202_p4 = pnand %p200_p3, %p197_p2 }
  0x2b   :  { %v95_v12 = vrot.slane %v90_v10, %v78_v8  ;;  %v99_v13 = vrot.slane %v90_v10, %v82_v9  ;;  %v79_v15 = vrot.slane %v74_v11, %v78_v8  ;;  %v83_v25 = vrot.slane %v74_v11, %v82_v9 }
  0x2e   :  { %v106_v37 = vld [vmem:[#allocation2] sm:$0xff] }
  0x98   :  { %v64_v6 = vpop.permute.xlu1 %63  ;;  %v53_v7 = vpop.permute.xlu0 %52 }
  0x9c   :  { %v66_v14 = vpop.permute.xlu1 %65  ;;  %v55_v16 = vpop.permute.xlu0 %54 }
  0x9d   :  { %v68_v17 = vsel %vm67_vm1, %v64_v6, %v66_v14  ;;  %v69_v18 = vsel %vm67_vm1, %v66_v14, %v64_v6  ;;  %v59_v19 = vsel %vm58_vm2, %v53_v7, %v55_v16  ;;  %v60_v20 = vsel %vm58_vm2, %v55_v16, %v53_v7 }
  0x9e   :  { %v70_v21 = vsub.f32 %v68_v17, %v50_v0  ;;  %v71_v22 = vsub.f32 %v69_v18, %v51_v1  ;;  %v61_v23 = vsub.f32 %v59_v19, %v50_v0  ;;  %v62_v24 = vsub.f32 %v60_v20, %v51_v1 }
  0xa0   :  { %v88_v26 = vand.u32 2147483647, %v70_v21  ;;  %v89_v27 = vand.u32 2147483647, %v71_v22  ;;  %v72_v28 = vand.u32 2147483647, %v61_v23 }
  0xa1   :  { %v73_v29 = vand.u32 2147483647, %v62_v24 }
  0xa2   :  { %v102_v30 = vmul.f32 %v95_v12, %v88_v26  ;;  %v103_v31 = vmul.f32 %v99_v13, %v89_v27  ;;  %v86_v32 = vmul.f32 %v79_v15, %v72_v28 }
  0xa3   :  { %v87_v33 = vmul.f32 %v83_v25, %v73_v29 }
  0xa4   :  { %v104_v34 = vadd.f32 %v102_v30, %v86_v32 }
  0xa5   :  { %v105_v35 = vadd.f32 %v103_v31, %v87_v33 }
  0xa7   :  { %v107_v36 = vadd.f32 %v105_v35, %v104_v34 }
  0xa9   :  { %108 = vadd.xlane.f32.xlu0 %v107_v36 }
 0x136   :  { %v109_v38 = vpop.xlane.xlu0 %108 }
 0x137   :  { %v110_v39 = vadd.f32 %v109_v38, %v106_v37 }
 0x139   :  { %112 = vst.msk [vmem:[#allocation2] sm:$0xff] %vm48_vm0, %v110_v39 }
 0x140   :  { %v116_v40 = vld [vmem:[#allocation2] sm:$0xff] }
 0x141   :  { %v117_v41 = vsel %vm48_vm0, %v116_v40, 0.0 }
 0x142   :  { %118 = vadd.xlane.f32.xlu1 %v117_v41 }
 0x1cf   :  { %v119_v42 = vpop.xlane.xlu1 %118 }
 0x1d0   :  { %v120_v43 = vrot.slane %v119_v42, 4 }
 0x1d2   :  { %v121_v44 = vadd.f32 %v120_v43, %v119_v42 }
 0x1d4   :  { %v122_v45 = vrot.slane %v121_v44, 2 }
 0x1d6   :  { %v123_v46 = vadd.f32 %v122_v45, %v121_v44 }
 0x1d8   :  { %v124_v47 = vrot.slane %v123_v46, 1 }
 0x1da   :  { %v125_v48 = vadd.f32 %v124_v47, %v123_v46 }
 0x1dc   :  { %144 = vpush %v125_v48 }
 0x20d   :  { %s145_s1 = spop %144 }
 0x20e   :  { %128 = sst [smem:[#allocation8]] %s145_s1 }
 0x20f   :  { %205 = shalt.err (!%p202_p4)
}
 0x210   :  { %s217_s18 = smov [#allocation8]  }
 0x211   :  { %136 = dma.smem_to_hbm %s217_s18, 16, %s283_s3, [#allocation5]  }
 0x212   :  { %210 = dma.done.wait [#allocation5], 16  }
 0x213   :  { %211 = vsyncadd [#allocation5], 4294967280 }
 0x214   :  { %140 = sfence }
 0x215   :  { %141 = vsyncpa [#allocation4], 1 }
 0x216   :  { %142 = vsyncpa [#allocation7], 1 }
 0x217   :  { %143 = vsyncpa [#allocation5], 1 }

</bundles_post_ra>
